<compile_context>
chip_gen: v6e
topology: v6e:2x2x1
jax: 0.10.0
libtpu: 0.0.40
codegen_flags: <defaults>
</compile_context>

<pallas_src>
import functools

import jax
import jax.numpy as jnp
from jax.experimental import pallas as pl
from jax.experimental.pallas import tpu as pltpu


def _round_up(v, m):
    return ((v + m - 1) // m) * m


def node_encoder_kernel(x_ref, w_ref, b_ref, o_ref):
    # x_ref: (tile, K)       packed node rows (P nodes share one 128-lane row)
    # w_ref: (K, E_pack)     block-diagonal packed weight (grid-invariant)
    # b_ref: (1, E_pack)     bias tiled P times (grid-invariant)
    # o_ref: (tile, E_pack)  packed, lane-dense output
    o_ref[...] = (
        jnp.dot(x_ref[...], w_ref[...], preferred_element_type=jnp.float32)
        + b_ref[...]
    ).astype(o_ref.dtype)


def pack_linear_params(weight, bias):
    """One-time packing of the nn.Linear parameters (torch convention).

    Args:
      weight: [embed_dim, num_node_features]  (== torch fc.weight)
      bias:   [embed_dim]                     (== torch fc.bias)
    Returns:
      w_pack: [P*num_node_features, P*embed_dim]  block-diagonal (kron(I_P, W^T))
      b_pack: [1, P*embed_dim]                    bias tiled P times
      P:      nodes packed per output row (128 // num_node_features, >= 1)
    """
    embed_dim, num_feat = weight.shape
    p = max(1, 128 // num_feat)
    w_t = weight.astype(jnp.float32).T                       # (F, E)
    w_pack = jnp.kron(jnp.eye(p, dtype=jnp.float32), w_t)    # (P*F, P*E)
    b_pack = jnp.tile(bias.astype(jnp.float32), p).reshape(1, p * embed_dim)
    return w_pack, b_pack, p


@functools.partial(jax.jit, static_argnames=("tile_cap",))
def node_encoder_forward(x, w_pack, b_pack, *, tile_cap=512):
    """Pallas implementation of NodeEncoder.forward.

    Args:
      x:      [num_nodes, num_node_features] float32  (dag_batch.x)
      w_pack: packed weight from pack_linear_params
      b_pack: packed bias   from pack_linear_params
      tile_cap: max packed rows (each = P nodes) per grid step.
    Returns:
      h_init: [num_nodes, embed_dim] float32
    """
    num_nodes, num_feat = x.shape
    k, e_pack = w_pack.shape
    p = k // num_feat
    embed_dim = e_pack // p

    if num_nodes == 0:  # static shape check; avoid a zero-size grid
        return jnp.zeros((0, embed_dim), jnp.float32)

    # --- packed-row geometry -------------------------------------------------
    n_pack = pl.cdiv(num_nodes, p)                 # packed rows actually needed
    n_pack8 = _round_up(n_pack, 8)                 # sublane-aligned
    # Grid steps: bound per-step size, balance tiles (so padding stays small,
    # never ~2x), and use >= 2 parallel steps once there is enough work so both
    # v7x TensorCores engage (no-op on v5e/v6e).
    g = max(pl.cdiv(n_pack8, tile_cap), 2 if n_pack8 >= 16 else 1)
    tile = _round_up(pl.cdiv(n_pack8, g), 8)
    n_pack_pad = g * tile
    n_pad = n_pack_pad * p

    # Tail-pad x only as far as needed, then take the free contiguous packed view.
    x = x.astype(jnp.float32)
    if n_pad != num_nodes:
        x = jnp.pad(x, ((0, n_pad - num_nodes), (0, 0)))
    x_pack = x.reshape(n_pack_pad, k)

    cost = pl.CostEstimate(
        flops=2 * n_pack_pad * k * e_pack,
        transcendentals=0,
        bytes_accessed=(x_pack.size + w_pack.size + b_pack.size
                        + n_pack_pad * e_pack) * 4,
    )

    out_pack = pl.pallas_call(
        node_encoder_kernel,
        out_shape=jax.ShapeDtypeStruct((n_pack_pad, e_pack), jnp.float32),
        grid=(g,),
        in_specs=[
            pl.BlockSpec((tile, k), lambda i: (i, 0)),       # packed x row tile
            pl.BlockSpec((k, e_pack), lambda i: (0, 0)),     # full W_pack (invariant)
            pl.BlockSpec((1, e_pack), lambda i: (0, 0)),     # packed bias (invariant)
        ],
        out_specs=pl.BlockSpec((tile, e_pack), lambda i: (i, 0)),
        compiler_params=pltpu.CompilerParams(
            dimension_semantics=("parallel",),
        ),
        cost_estimate=cost,
    )(x_pack, w_pack, b_pack)

    # (n_pack_pad, P*E) -> (n_pad, E) is a free contiguous view; drop pad rows.
    return out_pack.reshape(n_pad, embed_dim)[:num_nodes]


if __name__ == "__main__":
    # Small shapes consistent with the module:
    #   num_nodes (flattened node batch) = 16, num_node_features = 8, embed_dim = 32
    num_nodes, num_feat, embed_dim = 16, 8, 32

    key = jax.random.PRNGKey(0)
    kx, kw, kb = jax.random.split(key, 3)

    x = jax.random.normal(kx, (num_nodes, num_feat), dtype=jnp.float32)
    # torch nn.Linear convention: fc.weight is [out_features, in_features].
    weight = jax.random.normal(kw, (embed_dim, num_feat), dtype=jnp.float32) * 0.1
    bias = jax.random.normal(kb, (embed_dim,), dtype=jnp.float32) * 0.1

    # One-time parameter packing (init-time, outside the per-call path).
    w_pack, b_pack, P = pack_linear_params(weight, bias)

    h_init = jax.block_until_ready(node_encoder_forward(x, w_pack, b_pack))
    assert h_init.shape == (num_nodes, embed_dim)

    # Reference (torch-equivalent f32 math).  Tolerance covers the MXU's default
    # matmul precision mode; kernel math is otherwise f32 end-to-end.
    h_ref = x @ weight.T + bias
    assert jnp.allclose(h_init, h_ref, atol=5e-3, rtol=1e-2), \
        float(jnp.max(jnp.abs(h_init - h_ref)))

    # Exercise the padding + multi-step "parallel" grid path with a
    # non-multiple node count.
    n2 = 300
    x2 = jax.random.normal(jax.random.PRNGKey(1), (n2, num_feat), jnp.float32)
    h2 = jax.block_until_ready(node_encoder_forward(x2, w_pack, b_pack, tile_cap=8))
    assert h2.shape == (n2, embed_dim)
    h2_ref = x2 @ weight.T + bias
    assert jnp.allclose(h2, h2_ref, atol=5e-3, rtol=1e-2)

    # Zero-node edge case (empty graph batch).
    h0 = node_encoder_forward(jnp.zeros((0, num_feat), jnp.float32), w_pack, b_pack)
    assert h0.shape == (0, embed_dim)

    print("KERNEL_OK")
</pallas_src>

<mosaic_0001>
module attributes {stable_mosaic.version = 11 : i64} {
  func.func @node_encoder_kernel(%arg0: i32, %arg1: memref<8x128xf32, #tpu.memory_space<vmem>>, %arg2: memref<128x512xf32, #tpu.memory_space<vmem>>, %arg3: memref<1x512xf32, #tpu.memory_space<vmem>>, %arg4: memref<8x512xf32, #tpu.memory_space<vmem>>) attributes {dimension_semantics = [#tpu.dimension_semantics<parallel>], iteration_bounds = array<i64: 1>, scalar_prefetch = 0 : i64, scratch_operands = 0 : i64, tpu.core_type = #tpu.core_type<tc>, window_params = [{transform_indices = @transform_0, window_bounds = array<i64: 8, 128>}, {pipeline_mode = #tpu.pipeline_mode<synchronous>, transform_indices = @transform_1, window_bounds = array<i64: 128, 512>}, {pipeline_mode = #tpu.pipeline_mode<synchronous>, transform_indices = @transform_2, window_bounds = array<i64: 1, 512>}, {transform_indices = @transform_3, window_bounds = array<i64: 8, 512>}]} {
    %c0 = arith.constant 0 : index
    %c0_0 = arith.constant 0 : index
    %0 = vector.load %arg1[%c0, %c0_0] : memref<8x128xf32, #tpu.memory_space<vmem>>, vector<8x128xf32>
    %c0_1 = arith.constant 0 : index
    %c0_2 = arith.constant 0 : index
    %1 = vector.load %arg2[%c0_1, %c0_2] : memref<128x512xf32, #tpu.memory_space<vmem>>, vector<128x512xf32>
    %cst = arith.constant dense<0.000000e+00> : vector<8x512xf32>
    %2 = tpu.matmul %0, %1, %cst {dimension_numbers = #tpu.dot_dimension_numbers<[1], [0], [0], [1], [0, 0, 1, 1], [], []>} : vector<8x128xf32>, vector<128x512xf32>, vector<8x512xf32> -> vector<8x512xf32>
    %c0_3 = arith.constant 0 : index
    %c0_4 = arith.constant 0 : index
    %3 = vector.load %arg3[%c0_3, %c0_4] : memref<1x512xf32, #tpu.memory_space<vmem>>, vector<1x512xf32>
    %4 = vector.broadcast %3 : vector<1x512xf32> to vector<8x512xf32>
    %5 = arith.addf %2, %4 : vector<8x512xf32>
    %c0_5 = arith.constant 0 : index
    %c0_6 = arith.constant 0 : index
    %6 = vector.load %arg4[%c0_5, %c0_6] : memref<8x512xf32, #tpu.memory_space<vmem>>, vector<8x512xf32>
    tpu.vector_store %arg4[%c0_5, %c0_6], %5 {strides = array<i32>} : memref<8x512xf32, #tpu.memory_space<vmem>>, vector<8x512xf32>,
    return
  }
  func.func @transform_0(%arg0: i32) -> (i32, i32) {
    %c0_i32 = arith.constant 0 : i32
    %c0_i32_0 = arith.constant 0 : i32
    return %arg0, %c0_i32 : i32, i32
  }
  func.func @transform_1(%arg0: i32) -> (i32, i32) {
    %c0_i32 = arith.constant 0 : i32
    %c0_i32_0 = arith.constant 0 : i32
    %c0_i32_1 = arith.constant 0 : i32
    return %c0_i32, %c0_i32_0 : i32, i32
  }
  func.func @transform_2(%arg0: i32) -> (i32, i32) {
    %c0_i32 = arith.constant 0 : i32
    %c0_i32_0 = arith.constant 0 : i32
    %c0_i32_1 = arith.constant 0 : i32
    return %c0_i32, %c0_i32_0 : i32, i32
  }
  func.func @transform_3(%arg0: i32) -> (i32, i32) {
    %c0_i32 = arith.constant 0 : i32
    %c0_i32_0 = arith.constant 0 : i32
    return %arg0, %c0_i32 : i32, i32
  }
}

</mosaic_0001>

<bundles_post_ra>
// kernel: node_encoder_forward.1
= control target key start
LH: loop header
LB: loop body
LE: loop exit
PB: predicated region body
PF: predicated region fallthrough
CT: control target
= control target key end

     0   :  { %8 = vsyncpa [#allocation3], 0  ;;  %s292_s12 = smov [#allocation2]   ;;  %s337_s0 = inlined_call_operand.vmem [shape: f32[8,128], index: 0, kind: input, shape index: {}]   ;;  %s338_s1 = inlined_call_operand.hbm [shape: f32[128,512], index: 1, kind: input, shape index: {}]   ;;  %s339_s2 = inlined_call_operand.vmem [shape: f32[1,512], index: 2, kind: input, shape index: {}]   ;;  %s340_s3 = inlined_call_operand.vmem [shape: f32[8,512], index: 3, kind: output, shape index: {}]  }
   0x1   :  { %s16_s13 = sshll.u32 %s292_s12, 4  ;;  %s17_s13 = int_to_ptr.vmem [resolvable:$true] %s16_s13 }
   0x2   :  { %s278_s14 = scalar_lea.vmem %s17_s13, 8192  ;;  %p283_p1 = scmp.lt.s32.totalorder %s17_s13, %s17_s13 }
   0x3   :  { %p279_p0 = scmp.ne.s32.totalorder %s17_s13, %s278_s14  ;;  %p284_p2 = scmp.lt.s32.totalorder %s278_s14, %s278_s14 }
   0x5   :  { %p285_p3 = por %p284_p2, %p283_p1 }
   0x7   :  { %p286_p4 = pnand %p285_p3, %p279_p0 }
   0x9   :  { %289 = shalt.err (!%p286_p4)
}
   0xa   :  { %s293_s15 = smov 512   ;;  %s294_s16 = smov 32  }
   0xb   :  { %22 = dma.hbm_to_vmem [thread:$0]  %s338_s1, 8192, %s17_s13, [#allocation3], %s293_s15, %s293_s15, %s294_s16  }
   0xc   :  { %290 = dma.done.wait [#allocation3], 8192  }
   0xd   :  { %291 = vsyncadd [#allocation3], 4294959104  ;;  %v295_v0 = vmov 0.0   ;;  %v90_v1 = vld [vmem:[#allocation2 + $0x1e8] sm:$0xff]  ;;  %v92_v2 = vld [vmem:[#allocation2 + $0x1f8] sm:$0xff] }
   0xe   :  { %179 = vmatprep.mubr.f32.mxu0 %v295_v0  ;;  %250 = vmatprep.mubr.f32.mxu1 %v295_v0  ;;  %v89_v3 = vld [vmem:[#allocation2 + $0x1e0] sm:$0xff]  ;;  %v91_v4 = vld [vmem:[#allocation2 + $0x1f0] sm:$0xff]  ;;  %v86_v5 = vld [vmem:[#allocation2 + $0x1c8] sm:$0xff] }
   0xf   :  { %115 = vmatprep.subr.mxu0 %v90_v1  ;;  %186 = vmatprep.subr.mxu1 %v92_v2  ;;  %v88_v6 = vld [vmem:[#allocation2 + $0x1d8] sm:$0xff]  ;;  %v85_v7 = vld [vmem:[#allocation2 + $0x1c0] sm:$0xff]  ;;  %v87_v8 = vld [vmem:[#allocation2 + $0x1d0] sm:$0xff]  ;;  %v95_v2 = vlaneseq }
  0x10   :  { %116 = vmatpush1.msra.mxu0 %v89_v3  ;;  %187 = vmatpush1.msra.mxu1 %v91_v4  ;;  %v82_v9 = vld [vmem:[#allocation2 + $0x1a8] sm:$0xff]  ;;  %v84_v10 = vld [vmem:[#allocation2 + $0x1b8] sm:$0xff]  ;;  %v81_v11 = vld [vmem:[#allocation2 + $0x1a0] sm:$0xff] }
  0x11   :  { %117 = vmatprep.subr.mxu0 %v86_v5  ;;  %188 = vmatprep.subr.mxu1 %v88_v6  ;;  %v83_v12 = vld [vmem:[#allocation2 + $0x1b0] sm:$0xff]  ;;  %v78_v13 = vld [vmem:[#allocation2 + $0x188] sm:$0xff]  ;;  %v80_v14 = vld [vmem:[#allocation2 + $0x198] sm:$0xff]  ;;  %v96_v3 = vshrl.u32 %v95_v2, 7 }
  0x12   :  { %118 = vmatpush1.msra.mxu0 %v85_v7  ;;  %189 = vmatpush1.msra.mxu1 %v87_v8  ;;  %v77_v15 = vld [vmem:[#allocation2 + $0x180] sm:$0xff]  ;;  %v79_v16 = vld [vmem:[#allocation2 + $0x190] sm:$0xff]  ;;  %v74_v17 = vld [vmem:[#allocation2 + $0x168] sm:$0xff] }
  0x13   :  { %119 = vmatprep.subr.mxu0 %v82_v9  ;;  %190 = vmatprep.subr.mxu1 %v84_v10  ;;  %v76_v18 = vld [vmem:[#allocation2 + $0x178] sm:$0xff]  ;;  %v73_v19 = vld [vmem:[#allocation2 + $0x160] sm:$0xff]  ;;  %v75_v20 = vld [vmem:[#allocation2 + $0x170] sm:$0xff]  ;;  %v97_v4 = vsub.s32 0, %v96_v3  ;;  %v105_v5 = vsub.s32 2, %v96_v3  ;;  %v101_v7 = vsub.s32 1, %v96_v3 }
  0x14   :  { %120 = vmatpush1.msra.mxu0 %v81_v11  ;;  %191 = vmatpush1.msra.mxu1 %v83_v12  ;;  %v70_v21 = vld [vmem:[#allocation2 + $0x148] sm:$0xff]  ;;  %v72_v22 = vld [vmem:[#allocation2 + $0x158] sm:$0xff]  ;;  %v69_v23 = vld [vmem:[#allocation2 + $0x140] sm:$0xff]  ;;  %v109_v8 = vsub.s32 3, %v96_v3 }
  0x15   :  { %121 = vmatprep.subr.mxu0 %v78_v13  ;;  %192 = vmatprep.subr.mxu1 %v80_v14  ;;  %v71_v24 = vld [vmem:[#allocation2 + $0x150] sm:$0xff]  ;;  %v66_v25 = vld [vmem:[#allocation2 + $0x128] sm:$0xff]  ;;  %v68_v26 = vld [vmem:[#allocation2 + $0x138] sm:$0xff] }
  0x16   :  { %122 = vmatpush1.msra.mxu0 %v77_v15  ;;  %193 = vmatpush1.msra.mxu1 %v79_v16  ;;  %v65_v27 = vld [vmem:[#allocation2 + $0x120] sm:$0xff]  ;;  %v67_v28 = vld [vmem:[#allocation2 + $0x130] sm:$0xff]  ;;  %v62_v29 = vld [vmem:[#allocation2 + $0x108] sm:$0xff] }
  0x17   :  { %123 = vmatprep.subr.mxu0 %v74_v17  ;;  %194 = vmatprep.subr.mxu1 %v76_v18  ;;  %v64_v30 = vld [vmem:[#allocation2 + $0x118] sm:$0xff]  ;;  %v61_v31 = vld [vmem:[#allocation2 + $0x100] sm:$0xff]  ;;  %v63_v32 = vld [vmem:[#allocation2 + $0x110] sm:$0xff] }
  0x18   :  { %124 = vmatpush1.msra.mxu0 %v73_v19  ;;  %195 = vmatpush1.msra.mxu1 %v75_v20  ;;  %v58_v33 = vld [vmem:[#allocation2 + $0xe8] sm:$0xff]  ;;  %v60_v34 = vld [vmem:[#allocation2 + $0xf8] sm:$0xff]  ;;  %v57_v35 = vld [vmem:[#allocation2 + $0xe0] sm:$0xff] }
  0x19   :  { %125 = vmatprep.subr.mxu0 %v70_v21  ;;  %196 = vmatprep.subr.mxu1 %v72_v22  ;;  %v59_v36 = vld [vmem:[#allocation2 + $0xf0] sm:$0xff]  ;;  %v54_v37 = vld [vmem:[#allocation2 + $0xc8] sm:$0xff]  ;;  %v56_v38 = vld [vmem:[#allocation2 + $0xd8] sm:$0xff] }
  0x1a   :  { %126 = vmatpush1.msra.mxu0 %v69_v23  ;;  %197 = vmatpush1.msra.mxu1 %v71_v24  ;;  %v53_v39 = vld [vmem:[#allocation2 + $0xc0] sm:$0xff]  ;;  %v55_v40 = vld [vmem:[#allocation2 + $0xd0] sm:$0xff]  ;;  %v50_v41 = vld [vmem:[#allocation2 + $0xa8] sm:$0xff] }
  0x1b   :  { %127 = vmatprep.subr.mxu0 %v66_v25  ;;  %198 = vmatprep.subr.mxu1 %v68_v26  ;;  %v52_v42 = vld [vmem:[#allocation2 + $0xb8] sm:$0xff]  ;;  %v49_v43 = vld [vmem:[#allocation2 + $0xa0] sm:$0xff]  ;;  %v51_v44 = vld [vmem:[#allocation2 + $0xb0] sm:$0xff] }
  0x1c   :  { %128 = vmatpush1.msra.mxu0 %v65_v27  ;;  %199 = vmatpush1.msra.mxu1 %v67_v28  ;;  %v46_v45 = vld [vmem:[#allocation2 + $0x88] sm:$0xff]  ;;  %v48_v46 = vld [vmem:[#allocation2 + $0x98] sm:$0xff]  ;;  %v45_v47 = vld [vmem:[#allocation2 + $0x80] sm:$0xff] }
  0x1d   :  { %129 = vmatprep.subr.mxu0 %v62_v29  ;;  %200 = vmatprep.subr.mxu1 %v64_v30  ;;  %v47_v48 = vld [vmem:[#allocation2 + $0x90] sm:$0xff]  ;;  %v42_v49 = vld [vmem:[#allocation2 + $0x68] sm:$0xff]  ;;  %v44_v50 = vld [vmem:[#allocation2 + $0x78] sm:$0xff] }
  0x1e   :  { %130 = vmatpush1.msra.mxu0 %v61_v31  ;;  %201 = vmatpush1.msra.mxu1 %v63_v32  ;;  %v41_v51 = vld [vmem:[#allocation2 + $0x60] sm:$0xff]  ;;  %v43_v52 = vld [vmem:[#allocation2 + $0x70] sm:$0xff]  ;;  %v38_v53 = vld [vmem:[#allocation2 + $0x48] sm:$0xff] }
  0x1f   :  { %131 = vmatprep.subr.mxu0 %v58_v33  ;;  %202 = vmatprep.subr.mxu1 %v60_v34  ;;  %v40_v54 = vld [vmem:[#allocation2 + $0x58] sm:$0xff]  ;;  %v37_v55 = vld [vmem:[#allocation2 + $0x40] sm:$0xff]  ;;  %v39_v56 = vld [vmem:[#allocation2 + $0x50] sm:$0xff] }
  0x20   :  { %132 = vmatpush1.msra.mxu0 %v57_v35  ;;  %203 = vmatpush1.msra.mxu1 %v59_v36  ;;  %v34_v57 = vld [vmem:[#allocation2 + $0x28] sm:$0xff]  ;;  %v36_v58 = vld [vmem:[#allocation2 + $0x38] sm:$0xff]  ;;  %v33_v59 = vld [vmem:[#allocation2 + $0x20] sm:$0xff] }
  0x21   :  { %133 = vmatprep.subr.mxu0 %v54_v37  ;;  %204 = vmatprep.subr.mxu1 %v56_v38  ;;  %v35_v60 = vld [vmem:[#allocation2 + $0x30] sm:$0xff]  ;;  %v30_v61 = vld [vmem:[#allocation2 + $0x8] sm:$0xff]  ;;  %v32_v62 = vld [vmem:[#allocation2 + $0x18] sm:$0xff] }
  0x22   :  { %134 = vmatpush1.msra.mxu0 %v53_v39  ;;  %205 = vmatpush1.msra.mxu1 %v55_v40  ;;  %v29_v63 = vld [vmem:[#allocation2] sm:$0xff]  ;;  %v31_v0 = vld [vmem:[#allocation2 + $0x10] sm:$0xff] }
  0x23   :  { %135 = vmatprep.subr.mxu0 %v50_v41  ;;  %206 = vmatprep.subr.mxu1 %v52_v42  ;;  %v28_v1 = vld [vmem:[%s337_s0] sm:$0xff] }
  0x24   :  { %136 = vmatpush1.msra.mxu0 %v49_v43  ;;  %207 = vmatpush1.msra.mxu1 %v51_v44  ;;  %v93_v6 = vld [vmem:[%s339_s2] sm:$0xf] }
  0x25   :  { %137 = vmatprep.subr.mxu0 %v46_v45  ;;  %208 = vmatprep.subr.mxu1 %v48_v46  ;;  %v98_v9 = vrot.slane %v93_v6, %v97_v4  ;;  %v106_v10 = vrot.slane %v93_v6, %v105_v5  ;;  %v102_v11 = vrot.slane %v93_v6, %v101_v7 }
  0x26   :  { %138 = vmatpush1.msra.mxu0 %v45_v47  ;;  %209 = vmatpush1.msra.mxu1 %v47_v48  ;;  %v110_v12 = vrot.slane %v93_v6, %v109_v8 }
  0x27   :  { %139 = vmatprep.subr.mxu0 %v42_v49  ;;  %210 = vmatprep.subr.mxu1 %v44_v50 }
  0x28   :  { %140 = vmatpush1.msra.mxu0 %v41_v51  ;;  %211 = vmatpush1.msra.mxu1 %v43_v52 }
  0x29   :  { %141 = vmatprep.subr.mxu0 %v38_v53  ;;  %212 = vmatprep.subr.mxu1 %v40_v54 }
  0x2a   :  { %142 = vmatpush1.msra.mxu0 %v37_v55  ;;  %213 = vmatpush1.msra.mxu1 %v39_v56 }
  0x2b   :  { %143 = vmatprep.subr.mxu0 %v34_v57  ;;  %214 = vmatprep.subr.mxu1 %v36_v58 }
  0x2c   :  { %144 = vmatpush1.msra.mxu0 %v33_v59  ;;  %215 = vmatpush1.msra.mxu1 %v35_v60 }
  0x2d   :  { %145 = vmatprep.subr.mxu0 %v30_v61  ;;  %216 = vmatprep.subr.mxu1 %v32_v62 }
  0x2e   :  { %146 = vmatpush1.msra.mxu0 %v29_v63  ;;  %217 = vmatpush1.msra.mxu1 %v31_v0 }
  0x2f   :  { %180 = vmatmul.mubr.f32.vlgmr.msra.gmra.mxu0 %v28_v1  ;;  %251 = vmatmul.mubr.f32.vlgmr.msra.gmra.mxu1 %v28_v1 }
  0xef   :  { %v181_v13 = vpop.f32.mrf.mxu0  ;;  %v252_v14 = vpop.f32.mrf.mxu1 }
  0xf0   :  { %v182_v15 = vadd.f32 %v181_v13, %v98_v9  ;;  %v253_v16 = vadd.f32 %v252_v14, %v106_v10 }
  0xf1   :  { %v183_v17 = vpop.f32.mrf.mxu0  ;;  %v254_v18 = vpop.f32.mrf.mxu1 }
  0xf2   :  { %257 = vst [vmem:[%s340_s3] sm:$0xff] %v182_v15  ;;  %259 = vst [vmem:[%s340_s3 + $0x10] sm:$0xff] %v253_v16  ;;  %v184_v19 = vadd.f32 %v183_v17, %v102_v11  ;;  %v255_v20 = vadd.f32 %v254_v18, %v110_v12 }
  0xf4   :  { %258 = vst [vmem:[%s340_s3 + $0x8] sm:$0xff] %v184_v19  ;;  %260 = vst [vmem:[%s340_s3 + $0x18] sm:$0xff] %v255_v20 }
  0xf5   :  { %265 = vsyncpa [#allocation3], 1 }

</bundles_post_ra>
